<compile_context>
chip_gen: v6e
topology: v6e:2x2x1
jax: 0.10.0
libtpu: 0.0.40
codegen_flags: <defaults>
</compile_context>

<pallas_src>
import functools
import math

import jax
import jax.numpy as jnp
from jax import lax
from jax.experimental import pallas as pl
from jax.experimental.pallas import tpu as pltpu


LANE = 128  # TPU lane width; channel axes are padded to a multiple of this.


def _round_up(x, m):
    return (x + m - 1) // m * m


def _conv1d_relu_kernel(x_ref, w_ref, b_ref, o_ref, *,
                        stride, dilation, kernel_length, tile_l,
                        compute_dtype, single_tile):
    """One (batch row, L tile) of fused Conv1d + bias + ReLU.

    x_ref: (L_in_pad, C_in_pad)        VMEM (whole padded length of this row)
    w_ref: (K*C_in_pad, C_out_pad)     VMEM (pre-packed, constant block)
    b_ref: (1, C_out_pad)              VMEM
    o_ref: (TL, C_out_pad)             VMEM (lane-dense output tile)
    """
    K, TL = kernel_length, tile_l

    if single_tile:
        l0 = 0  # static offsets -> pure static slices
    else:
        l0 = pl.program_id(1) * (TL * stride)
        if (TL * stride) % 8 == 0:
            l0 = pl.multiple_of(l0, 8)

    # Build the im2col slab: K shifted (TL, C_in_pad) views concatenated along
    # the lane axis -> (TL, K*C_in_pad).  One deep MXU contraction instead of
    # K shallow ones.
    taps = []
    for k in range(K):
        start = l0 + k * dilation
        if stride == 1:
            xk = x_ref[pl.ds(start, TL), :]
        else:
            win = x_ref[pl.ds(start, (TL - 1) * stride + 1), :]
            xk = win[::stride, :]
        taps.append(xk.astype(compute_dtype))
    slab = taps[0] if K == 1 else jnp.concatenate(taps, axis=-1)

    acc = jnp.dot(slab, w_ref[...].astype(compute_dtype),
                  preferred_element_type=jnp.float32)      # (TL, C_out_pad)
    acc = acc + b_ref[...].astype(jnp.float32)             # (1, C_out_pad) bcast
    o_ref[...] = jnp.maximum(acc, 0.0).astype(o_ref.dtype)


def conv1d_relu_lane128(x_nlc, w_packed, b_pad, *, kernel_length, stride=1,
                        dilation=1, compute_dtype=jnp.float32, tl_max=512):
    """One Conv1d+ReLU layer on lane-padded NLC activations.

    x_nlc:    (N, L_in, C_in_pad)   channels already padded to LANE multiple
    w_packed: (K*C_in_pad, C_out_pad)
    b_pad:    (1, C_out_pad)
    returns   (N, L_out, C_out_pad)
    """
    N, L_in, C_in_pad = x_nlc.shape
    K = kernel_length
    assert w_packed.shape[0] == K * C_in_pad
    C_out_pad = w_packed.shape[1]

    L_out = (L_in - dilation * (K - 1) - 1) // stride + 1
    assert L_out > 0

    # Tile the output length; TL == L_out (full dim) when small, else a
    # multiple of 8 so the (8,128) block constraint holds.
    if L_out <= tl_max:
        TL, num_tiles = L_out, 1
    else:
        TL = tl_max
        num_tiles = pl.cdiv(L_out, TL)

    # Pad L so the last (possibly partial) tile's input window is in-bounds;
    # the extra output rows are clipped by Pallas on writeback.
    need_l_in = (num_tiles * TL - 1) * stride + (K - 1) * dilation + 1
    if need_l_in > L_in:
        x_nlc = jnp.pad(x_nlc, ((0, 0), (0, need_l_in - L_in), (0, 0)))
        L_in = need_l_in

    itemsize = jnp.dtype(x_nlc.dtype).itemsize
    x_bytes = L_in * C_in_pad * itemsize
    o_bytes = TL * C_out_pad * itemsize
    w_bytes = K * C_in_pad * C_out_pad * jnp.dtype(w_packed.dtype).itemsize
    b_bytes = C_out_pad * jnp.dtype(b_pad.dtype).itemsize
    # Double-buffered input/output tiles + weights + headroom, capped well
    # under v7x's 64 MiB physical VMEM.
    vmem_limit = int(min(max(2 * (x_bytes + o_bytes) + w_bytes + b_bytes
                             + (4 << 20), 8 << 20), 48 << 20))

    kernel = functools.partial(
        _conv1d_relu_kernel, stride=stride, dilation=dilation,
        kernel_length=K, tile_l=TL, compute_dtype=compute_dtype,
        single_tile=(num_tiles == 1))

    return pl.pallas_call(
        kernel,
        out_shape=jax.ShapeDtypeStruct((N, L_out, C_out_pad), x_nlc.dtype),
        grid=(N, num_tiles),
        in_specs=[
            # x: one batch row, whole (padded) length; block index is constant
            # across L tiles -> DMA'd once per batch row, reused across tiles.
            pl.BlockSpec((None, L_in, C_in_pad), lambda n, j: (n, 0, 0)),
            # packed weights / bias: constant blocks, fetched once.
            pl.BlockSpec((K * C_in_pad, C_out_pad), lambda n, j: (0, 0)),
            pl.BlockSpec((1, C_out_pad), lambda n, j: (0, 0)),
        ],
        out_specs=pl.BlockSpec((None, TL, C_out_pad), lambda n, j: (n, j, 0)),
        compiler_params=pltpu.CompilerParams(
            dimension_semantics=("parallel", "parallel"),
            vmem_limit_bytes=vmem_limit),
    )(x_nlc, w_packed, b_pad)


class ConvNet1dPallas:
    """Mirror of the PyTorch ConvNet1d (default: no batch_norm, no dropout)."""

    def __init__(self, in_channels, hidden_channels, kernel_lengths,
                 dropout=None, stride=1, dilation=1, batch_norm=False,
                 seed=0, compute_dtype=jnp.float32):
        assert len(hidden_channels) == len(kernel_lengths)
        # TODO(synk): batch_norm / dropout branches not implemented (defaults are off).
        assert not batch_norm and dropout is None
        self.stride = stride
        self.dilation = dilation
        self.compute_dtype = compute_dtype

        self.params = []   # unpacked (K, C_in, C_out) weights / (1, C_out) bias
        self.layers = []   # packed, lane-padded parameters + static metadata
        key = jax.random.PRNGKey(seed)
        c_in = in_channels
        for c_out, k in zip(hidden_channels, kernel_lengths):
            key, kw, kb = jax.random.split(key, 3)
            # Deterministic init mimicking PyTorch U(-bound, bound), bound = 1/sqrt(fan_in).
            bound = 1.0 / math.sqrt(float(c_in * k))
            w = jax.random.uniform(kw, (k, c_in, c_out), jnp.float32, -bound, bound)
            b = jax.random.uniform(kb, (1, c_out), jnp.float32, -bound, bound)
            self.params.append((w, b))

            # One-time lane padding + (K*C_in_pad, C_out_pad) repack.
            c_in_pad = _round_up(c_in, LANE)
            c_out_pad = _round_up(c_out, LANE)
            w_pad = jnp.zeros((k, c_in_pad, c_out_pad), jnp.float32)
            w_pad = w_pad.at[:, :c_in, :c_out].set(w)
            w_packed = w_pad.reshape(k * c_in_pad, c_out_pad)
            b_packed = jnp.zeros((1, c_out_pad), jnp.float32).at[:, :c_out].set(b)
            self.layers.append(dict(K=k, c_in=c_in, c_out=c_out,
                                    c_in_pad=c_in_pad, c_out_pad=c_out_pad,
                                    w=w_packed, b=b_packed))
            c_in = c_out

        self._forward = jax.jit(self._forward_impl)

    def _forward_impl(self, x_ncl, weights, biases):
        # NCL -> NLC once; pad channels to the lane width once; chain layers
        # entirely in the lane-padded domain (padded channels stay exactly 0).
        x = jnp.transpose(x_ncl, (0, 2, 1))
        c_in_pad0 = self.layers[0]["c_in_pad"]
        x = jnp.pad(x, ((0, 0), (0, 0), (0, c_in_pad0 - x.shape[-1])))
        for layer, w, b in zip(self.layers, weights, biases):
            x = conv1d_relu_lane128(
                x, w, b, kernel_length=layer["K"], stride=self.stride,
                dilation=self.dilation, compute_dtype=self.compute_dtype)
        x = x[:, :, :self.layers[-1]["c_out"]]     # drop lane padding
        return jnp.transpose(x, (0, 2, 1))          # NLC -> NCL

    def __call__(self, x_ncl):
        ws = tuple(layer["w"] for layer in self.layers)
        bs = tuple(layer["b"] for layer in self.layers)
        return self._forward(x_ncl, ws, bs)


def _reference_forward(x_ncl, params, stride, dilation):
    """Pure-JAX reference using lax.conv_general_dilated (NCL layout)."""
    x = x_ncl
    for w_kio, b in params:
        w_oik = jnp.transpose(w_kio, (2, 1, 0))  # (C_out, C_in, K) like PyTorch
        y = lax.conv_general_dilated(
            x, w_oik, window_strides=(stride,), padding="VALID",
            rhs_dilation=(dilation,),
            dimension_numbers=("NCH", "OIH", "NCH"))
        y = y + b.reshape(1, -1, 1)
        x = jnp.maximum(y, 0.0)
    return x


if __name__ == "__main__":
    batch, in_channels, length = 2, 4, 16
    hidden_channels = [8, 16]
    kernel_lengths = [3, 5]

    key = jax.random.PRNGKey(0)
    x = jax.random.normal(key, (batch, in_channels, length), jnp.float32)  # NCL

    # Default config (stride=1, dilation=1), matches the PyTorch module defaults.
    net = ConvNet1dPallas(in_channels, hidden_channels, kernel_lengths, seed=0)
    out = jax.block_until_ready(net(x))
    ref = _reference_forward(x, net.params, net.stride, net.dilation)
    assert out.shape == ref.shape, (out.shape, ref.shape)
    assert jnp.allclose(out, ref, atol=1e-5, rtol=1e-5), "mismatch vs reference"

    # Dilated config (same static-slice code path, different tap offsets).
    net_d = ConvNet1dPallas(in_channels, hidden_channels, kernel_lengths,
                            dilation=2, seed=1)
    out_d = jax.block_until_ready(net_d(x))
    ref_d = _reference_forward(x, net_d.params, net_d.stride, net_d.dilation)
    assert out_d.shape == ref_d.shape, (out_d.shape, ref_d.shape)
    assert jnp.allclose(out_d, ref_d, atol=1e-5, rtol=1e-5), "dilated mismatch"

    print("KERNEL_OK")
</pallas_src>

<mosaic_0001>
module attributes {stable_mosaic.version = 11 : i64} {
  func.func @_conv1d_relu_kernel(%arg0: i32, %arg1: i32, %arg2: memref<1x16x128xf32, #tpu.memory_space<vmem>>, %arg3: memref<384x128xf32, #tpu.memory_space<vmem>>, %arg4: memref<1x128xf32, #tpu.memory_space<vmem>>, %arg5: memref<1x14x128xf32, #tpu.memory_space<vmem>>) attributes {dimension_semantics = [#tpu.dimension_semantics<parallel>, #tpu.dimension_semantics<parallel>], iteration_bounds = array<i64: 2, 1>, scalar_prefetch = 0 : i64, scratch_operands = 0 : i64, tpu.core_type = #tpu.core_type<tc>, window_params = [{transform_indices = @transform_0, window_bounds = array<i64: 1, 16, 128>}, {pipeline_mode = #tpu.pipeline_mode<synchronous>, transform_indices = @transform_1, window_bounds = array<i64: 384, 128>}, {pipeline_mode = #tpu.pipeline_mode<synchronous>, transform_indices = @transform_2, window_bounds = array<i64: 1, 128>}, {transform_indices = @transform_3, window_bounds = array<i64: 1, 14, 128>}]} {
    %c0 = arith.constant 0 : index
    %c0_0 = arith.constant 0 : index
    %c0_1 = arith.constant 0 : index
    %0 = vector.load %arg2[%c0, %c0_0, %c0_1] : memref<1x16x128xf32, #tpu.memory_space<vmem>>, vector<1x14x128xf32>
    %1 = vector.shape_cast %0 : vector<1x14x128xf32> to vector<14x128xf32>
    %c0_2 = arith.constant 0 : index
    %c1 = arith.constant 1 : index
    %c0_3 = arith.constant 0 : index
    %2 = vector.load %arg2[%c0_2, %c1, %c0_3] : memref<1x16x128xf32, #tpu.memory_space<vmem>>, vector<1x14x128xf32>
    %3 = vector.shape_cast %2 : vector<1x14x128xf32> to vector<14x128xf32>
    %c0_4 = arith.constant 0 : index
    %c2 = arith.constant 2 : index
    %c0_5 = arith.constant 0 : index
    %4 = vector.load %arg2[%c0_4, %c2, %c0_5] : memref<1x16x128xf32, #tpu.memory_space<vmem>>, vector<1x14x128xf32>
    %5 = vector.shape_cast %4 : vector<1x14x128xf32> to vector<14x128xf32>
    %6 = tpu.concatenate %1, %3, %5 in 1 : vector<14x128xf32>, vector<14x128xf32>, vector<14x128xf32> -> vector<14x384xf32>
    %c0_6 = arith.constant 0 : index
    %c0_7 = arith.constant 0 : index
    %7 = vector.load %arg3[%c0_6, %c0_7] : memref<384x128xf32, #tpu.memory_space<vmem>>, vector<384x128xf32>
    %cst = arith.constant dense<0.000000e+00> : vector<14x128xf32>
    %8 = tpu.matmul %6, %7, %cst {dimension_numbers = #tpu.dot_dimension_numbers<[1], [0], [0], [1], [0, 0, 1, 1], [], []>} : vector<14x384xf32>, vector<384x128xf32>, vector<14x128xf32> -> vector<14x128xf32>
    %c0_8 = arith.constant 0 : index
    %c0_9 = arith.constant 0 : index
    %9 = vector.load %arg4[%c0_8, %c0_9] : memref<1x128xf32, #tpu.memory_space<vmem>>, vector<1x128xf32>
    %10 = vector.broadcast %9 : vector<1x128xf32> to vector<14x128xf32>
    %11 = arith.addf %8, %10 : vector<14x128xf32>
    %cst_10 = arith.constant 0.000000e+00 : f32
    %12 = vector.broadcast %cst_10 : f32 to vector<14x128xf32>
    %13 = arith.maximumf %11, %12 : vector<14x128xf32>
    %c0_11 = arith.constant 0 : index
    %c0_12 = arith.constant 0 : index
    %c0_13 = arith.constant 0 : index
    %14 = vector.load %arg5[%c0_11, %c0_12, %c0_13] : memref<1x14x128xf32, #tpu.memory_space<vmem>>, vector<1x14x128xf32>
    %15 = vector.shape_cast %14 : vector<1x14x128xf32> to vector<14x128xf32>
    %16 = vector.shape_cast %13 : vector<14x128xf32> to vector<1x14x128xf32>
    tpu.vector_store %arg5[%c0_11, %c0_12, %c0_13], %16 {strides = array<i32>} : memref<1x14x128xf32, #tpu.memory_space<vmem>>, vector<1x14x128xf32>,
    return
  }
  func.func @transform_0(%arg0: i32, %arg1: i32) -> (i32, i32, i32) {
    %c0_i32 = arith.constant 0 : i32
    %c0_i32_0 = arith.constant 0 : i32
    %c0_i32_1 = arith.constant 0 : i32
    return %arg0, %c0_i32, %c0_i32_0 : i32, i32, i32
  }
  func.func @transform_1(%arg0: i32, %arg1: i32) -> (i32, i32) {
    %c0_i32 = arith.constant 0 : i32
    %c0_i32_0 = arith.constant 0 : i32
    %c0_i32_1 = arith.constant 0 : i32
    return %c0_i32, %c0_i32_0 : i32, i32
  }
  func.func @transform_2(%arg0: i32, %arg1: i32) -> (i32, i32) {
    %c0_i32 = arith.constant 0 : i32
    %c0_i32_0 = arith.constant 0 : i32
    %c0_i32_1 = arith.constant 0 : i32
    return %c0_i32, %c0_i32_0 : i32, i32
  }
  func.func @transform_3(%arg0: i32, %arg1: i32) -> (i32, i32, i32) {
    %c0_i32 = arith.constant 0 : i32
    %c0_i32_0 = arith.constant 0 : i32
    return %arg0, %arg1, %c0_i32 : i32, i32, i32
  }
}

module attributes {stable_mosaic.version = 11 : i64} {
  func.func @_conv1d_relu_kernel(%arg0: i32, %arg1: i32, %arg2: memref<1x14x128xf32, #tpu.memory_space<vmem>>, %arg3: memref<640x128xf32, #tpu.memory_space<vmem>>, %arg4: memref<1x128xf32, #tpu.memory_space<vmem>>, %arg5: memref<1x10x128xf32, #tpu.memory_space<vmem>>) attributes {dimension_semantics = [#tpu.dimension_semantics<parallel>, #tpu.dimension_semantics<parallel>], iteration_bounds = array<i64: 2, 1>, scalar_prefetch = 0 : i64, scratch_operands = 0 : i64, tpu.core_type = #tpu.core_type<tc>, window_params = [{transform_indices = @transform_0, window_bounds = array<i64: 1, 14, 128>}, {pipeline_mode = #tpu.pipeline_mode<synchronous>, transform_indices = @transform_1, window_bounds = array<i64: 640, 128>}, {pipeline_mode = #tpu.pipeline_mode<synchronous>, transform_indices = @transform_2, window_bounds = array<i64: 1, 128>}, {transform_indices = @transform_3, window_bounds = array<i64: 1, 10, 128>}]} {
    %c0 = arith.constant 0 : index
    %c0_0 = arith.constant 0 : index
    %c0_1 = arith.constant 0 : index
    %0 = vector.load %arg2[%c0, %c0_0, %c0_1] : memref<1x14x128xf32, #tpu.memory_space<vmem>>, vector<1x10x128xf32>
    %1 = vector.shape_cast %0 : vector<1x10x128xf32> to vector<10x128xf32>
    %c0_2 = arith.constant 0 : index
    %c1 = arith.constant 1 : index
    %c0_3 = arith.constant 0 : index
    %2 = vector.load %arg2[%c0_2, %c1, %c0_3] : memref<1x14x128xf32, #tpu.memory_space<vmem>>, vector<1x10x128xf32>
    %3 = vector.shape_cast %2 : vector<1x10x128xf32> to vector<10x128xf32>
    %c0_4 = arith.constant 0 : index
    %c2 = arith.constant 2 : index
    %c0_5 = arith.constant 0 : index
    %4 = vector.load %arg2[%c0_4, %c2, %c0_5] : memref<1x14x128xf32, #tpu.memory_space<vmem>>, vector<1x10x128xf32>
    %5 = vector.shape_cast %4 : vector<1x10x128xf32> to vector<10x128xf32>
    %c0_6 = arith.constant 0 : index
    %c3 = arith.constant 3 : index
    %c0_7 = arith.constant 0 : index
    %6 = vector.load %arg2[%c0_6, %c3, %c0_7] : memref<1x14x128xf32, #tpu.memory_space<vmem>>, vector<1x10x128xf32>
    %7 = vector.shape_cast %6 : vector<1x10x128xf32> to vector<10x128xf32>
    %c0_8 = arith.constant 0 : index
    %c4 = arith.constant 4 : index
    %c0_9 = arith.constant 0 : index
    %8 = vector.load %arg2[%c0_8, %c4, %c0_9] : memref<1x14x128xf32, #tpu.memory_space<vmem>>, vector<1x10x128xf32>
    %9 = vector.shape_cast %8 : vector<1x10x128xf32> to vector<10x128xf32>
    %10 = tpu.concatenate %1, %3, %5, %7, %9 in 1 : vector<10x128xf32>, vector<10x128xf32>, vector<10x128xf32>, vector<10x128xf32>, vector<10x128xf32> -> vector<10x640xf32>
    %c0_10 = arith.constant 0 : index
    %c0_11 = arith.constant 0 : index
    %11 = vector.load %arg3[%c0_10, %c0_11] : memref<640x128xf32, #tpu.memory_space<vmem>>, vector<640x128xf32>
    %cst = arith.constant dense<0.000000e+00> : vector<10x128xf32>
    %12 = tpu.matmul %10, %11, %cst {dimension_numbers = #tpu.dot_dimension_numbers<[1], [0], [0], [1], [0, 0, 1, 1], [], []>} : vector<10x640xf32>, vector<640x128xf32>, vector<10x128xf32> -> vector<10x128xf32>
    %c0_12 = arith.constant 0 : index
    %c0_13 = arith.constant 0 : index
    %13 = vector.load %arg4[%c0_12, %c0_13] : memref<1x128xf32, #tpu.memory_space<vmem>>, vector<1x128xf32>
    %14 = vector.broadcast %13 : vector<1x128xf32> to vector<10x128xf32>
    %15 = arith.addf %12, %14 : vector<10x128xf32>
    %cst_14 = arith.constant 0.000000e+00 : f32
    %16 = vector.broadcast %cst_14 : f32 to vector<10x128xf32>
    %17 = arith.maximumf %15, %16 : vector<10x128xf32>
    %c0_15 = arith.constant 0 : index
    %c0_16 = arith.constant 0 : index
    %c0_17 = arith.constant 0 : index
    %18 = vector.load %arg5[%c0_15, %c0_16, %c0_17] : memref<1x10x128xf32, #tpu.memory_space<vmem>>, vector<1x10x128xf32>
    %19 = vector.shape_cast %18 : vector<1x10x128xf32> to vector<10x128xf32>
    %20 = vector.shape_cast %17 : vector<10x128xf32> to vector<1x10x128xf32>
    tpu.vector_store %arg5[%c0_15, %c0_16, %c0_17], %20 {strides = array<i32>} : memref<1x10x128xf32, #tpu.memory_space<vmem>>, vector<1x10x128xf32>,
    return
  }
  func.func @transform_0(%arg0: i32, %arg1: i32) -> (i32, i32, i32) {
    %c0_i32 = arith.constant 0 : i32
    %c0_i32_0 = arith.constant 0 : i32
    %c0_i32_1 = arith.constant 0 : i32
    return %arg0, %c0_i32, %c0_i32_0 : i32, i32, i32
  }
  func.func @transform_1(%arg0: i32, %arg1: i32) -> (i32, i32) {
    %c0_i32 = arith.constant 0 : i32
    %c0_i32_0 = arith.constant 0 : i32
    %c0_i32_1 = arith.constant 0 : i32
    return %c0_i32, %c0_i32_0 : i32, i32
  }
  func.func @transform_2(%arg0: i32, %arg1: i32) -> (i32, i32) {
    %c0_i32 = arith.constant 0 : i32
    %c0_i32_0 = arith.constant 0 : i32
    %c0_i32_1 = arith.constant 0 : i32
    return %c0_i32, %c0_i32_0 : i32, i32
  }
  func.func @transform_3(%arg0: i32, %arg1: i32) -> (i32, i32, i32) {
    %c0_i32 = arith.constant 0 : i32
    %c0_i32_0 = arith.constant 0 : i32
    return %arg0, %arg1, %c0_i32 : i32, i32, i32
  }
}

</mosaic_0001>

<bundles_post_ra>
// kernel: _forward_impl.2
= control target key start
LH: loop header
LB: loop body
LE: loop exit
PB: predicated region body
PF: predicated region fallthrough
CT: control target
= control target key end

     0   :  { %8 = vsyncpa [#allocation3], 0  ;;  %s738_s12 = smov 0   ;;  %s740_s13 = smov 0   ;;  %s817_s0 = inlined_call_operand.vmem [shape: f32[2,16,128], index: 0, kind: input, shape index: {}]   ;;  %s818_s1 = inlined_call_operand.hbm [shape: f32[384,128], index: 1, kind: input, shape index: {}]   ;;  %s819_s2 = inlined_call_operand.vmem [shape: f32[1,128], index: 2, kind: input, shape index: {}]   ;;  %s820_s3 = inlined_call_operand.vmem [shape: f32[2,14,128], index: 3, kind: output, shape index: {}]  }
   0x1   :  { %s742_s14 = smov 0  }
   0x2 LB: > { %s517_s15 = sadd.s32 4294967295, %s713_s14   ;;  %s26_s16 = sadd.s32 1, %s709_s13  ;;  %s713_s14 = sphi %s742_s14, %s14_s14   ;;  %s709_s13 = sphi %s740_s13, %s824_s13   ;;  %s705_s12 = sphi %s738_s12, %s823_s12  }
   0x3   : > { %p28_p0 = scmp.ge.s32.totalorder %s26_s16, 2  ;;  %p519_p1 = scmp.ge.s32.totalorder %s713_s14, 1 }
   0x4   : > { %p127_p2 = scmp.lt.s32.totalorder %s713_s14, 3  ;;  %p763_p4 = scmp.eq.s32.totalorder %s517_s15, 0 }
   0x5   : > { %s826_s16 = smov (%p28_p0, %s26_s16), 0  ;;  %s715_s19 = smov [#allocation2]  }
   0x6   : > { %p759_p3 = pnand %p519_p1, %p127_p2  ;;  %s139_s20 = sshll.u32 %s715_s19, 4  ;;  %s140_s20 = int_to_ptr.vmem [resolvable:$true] %s139_s20 }
   0x7   : > { %s672_s21 = scalar_lea.vmem %s140_s20, 6144  ;;  %p680_p11 = scmp.lt.s32.totalorder %s140_s20, %s140_s20 }
   0x8   : > { %p628_p5 = pneg %p759_p3  ;;  %p673_p8 = scmp.ne.s32.totalorder %s140_s20, %s672_s21 }
   0x9   : > { %p681_p12 = scmp.lt.s32.totalorder %s672_s21, %s672_s21 }
   0xa   : > { %p629_p6 = pnand %p763_p4, %p628_p5 }
   0xb   : > { %p682_p13 = por %p681_p12, %p680_p11 }
   0xc   : > { %p663_p7 = pneg %p629_p6 }
   0xe   : > { %p675_p9 = pnand %p673_p8, %p663_p7 }
  0x10   : > { %p676_p10 = pneg %p675_p9 }
  0x12   : > { %p683_p0 = pnand %p682_p13, %p676_p10 }
  0x14   : > { %686 = shalt.err (!%p683_p0)
}
  0x15   : > { %s716_s22 = smov 128   ;;  %s717_s23 = smov 8  }
  0x16   : > { %631 = dma.hbm_to_vmem [thread:$0]  (!%p629_p6), %s818_s1, 6144, %s140_s20, [#allocation3], %s716_s22, %s716_s22, %s717_s23  }
  0x17   : > { %166 = sbr.rel (%p759_p3) target bundleno = 270 (0x10e), region = 32 }
  0x1c   : > { %700 = dma.done.wait (%p763_p4), [#allocation3], 6144  }
  0x1d   : > { %702 = vsyncadd (%p763_p4), [#allocation3], 4294961152  ;;  %v246_v0 = vld [vmem:[#allocation2 + $0xf8] sm:$0xff]  ;;  %v245_v2 = vld [vmem:[#allocation2 + $0xf0] sm:$0xff]  ;;  %p194_p1 = scmp.lt.s32.totalorder %s705_s12, 1 }
  0x1e   : > { %v230_v1 = vld [vmem:[#allocation2 + $0x78] sm:$0xff]  ;;  %533 = vmatprep.subr.mxu0 %v246_v0  ;;  %v229_v3 = vld [vmem:[#allocation2 + $0x70] sm:$0xff]  ;;  %v244_v5 = vld [vmem:[#allocation2 + $0xe8] sm:$0xff] }
  0x1f   : > { %v262_v4 = vld [vmem:[#allocation2 + $0x178] sm:$0xff]  ;;  %534 = vmatpush3.msra.mxu0 %v230_v1  ;;  %v261_v6 = vld [vmem:[#allocation2 + $0x170] sm:$0xff]  ;;  %v228_v7 = vld [vmem:[#allocation2 + $0x68] sm:$0xff]  ;;  %s828_s12 = smov (!%p194_p1, %s705_s12), 1 }
  0x20   : > { %589 = vmatprep.subr.mxu1 %v262_v4  ;;  %535 = vmatprep.subr.mxu0 %v245_v2  ;;  %v260_v8 = vld [vmem:[#allocation2 + $0x168] sm:$0xff]  ;;  %v243_v9 = vld [vmem:[#allocation2 + $0xe0] sm:$0xff]  ;;  %v242_v12 = vld [vmem:[#allocation2 + $0xd8] sm:$0xff]  ;;  %s531_s26 = sshll.u32 %s828_s12, 4 }
  0x21   : > { %590 = vmatpush3.msra.mxu1 %v262_v4  ;;  %536 = vmatpush3.msra.mxu0 %v229_v3  ;;  %v227_v10 = vld [vmem:[#allocation2 + $0x60] sm:$0xff]  ;;  %v226_v13 = vld [vmem:[#allocation2 + $0x58] sm:$0xff]  ;;  %v241_v15 = vld [vmem:[#allocation2 + $0xd0] sm:$0xff]  ;;  %s792_s29 = scalar_lea.vmem %s817_s0, %s531_s26  ;;  %s207_s7 = scalar_lea.vmem %s820_s3, %s531_s26 }
  0x22   : > { %591 = vmatprep.subr.mxu1 %v261_v6  ;;  %537 = vmatprep.subr.mxu0 %v244_v5  ;;  %v259_v11 = vld [vmem:[#allocation2 + $0x160] sm:$0xff]  ;;  %v258_v14 = vld [vmem:[#allocation2 + $0x158] sm:$0xff]  ;;  %v225_v16 = vld [vmem:[#allocation2 + $0x50] sm:$0xff] }
  0x23   : > { %592 = vmatpush3.msra.mxu1 %v261_v6  ;;  %538 = vmatpush3.msra.mxu0 %v228_v7  ;;  %v257_v17 = vld [vmem:[#allocation2 + $0x150] sm:$0xff]  ;;  %v240_v18 = vld [vmem:[#allocation2 + $0xc8] sm:$0xff]  ;;  %v239_v21 = vld [vmem:[#allocation2 + $0xc0] sm:$0xff] }
  0x24   : > { %593 = vmatprep.subr.mxu1 %v260_v8  ;;  %539 = vmatprep.subr.mxu0 %v243_v9  ;;  %v224_v19 = vld [vmem:[#allocation2 + $0x48] sm:$0xff]  ;;  %v223_v22 = vld [vmem:[#allocation2 + $0x40] sm:$0xff]  ;;  %v238_v24 = vld [vmem:[#allocation2 + $0xb8] sm:$0xff] }
  0x25   : > { %594 = vmatpush3.msra.mxu1 %v260_v8  ;;  %540 = vmatpush3.msra.mxu0 %v227_v10  ;;  %v256_v20 = vld [vmem:[#allocation2 + $0x148] sm:$0xff]  ;;  %v255_v23 = vld [vmem:[#allocation2 + $0x140] sm:$0xff]  ;;  %v222_v25 = vld [vmem:[#allocation2 + $0x38] sm:$0xff] }
  0x26   : > { %595 = vmatprep.subr.mxu1 %v259_v11  ;;  %541 = vmatprep.subr.mxu0 %v242_v12  ;;  %v254_v26 = vld [vmem:[#allocation2 + $0x138] sm:$0xff]  ;;  %v237_v27 = vld [vmem:[#allocation2 + $0xb0] sm:$0xff]  ;;  %v236_v30 = vld [vmem:[#allocation2 + $0xa8] sm:$0xff] }
  0x27   : > { %596 = vmatpush3.msra.mxu1 %v259_v11  ;;  %542 = vmatpush3.msra.mxu0 %v226_v13  ;;  %v221_v28 = vld [vmem:[#allocation2 + $0x30] sm:$0xff]  ;;  %v220_v31 = vld [vmem:[#allocation2 + $0x28] sm:$0xff]  ;;  %v235_v33 = vld [vmem:[#allocation2 + $0xa0] sm:$0xff] }
  0x28   : > { %597 = vmatprep.subr.mxu1 %v258_v14  ;;  %543 = vmatprep.subr.mxu0 %v241_v15  ;;  %v253_v29 = vld [vmem:[#allocation2 + $0x130] sm:$0xff]  ;;  %v252_v32 = vld [vmem:[#allocation2 + $0x128] sm:$0xff]  ;;  %v219_v34 = vld [vmem:[#allocation2 + $0x20] sm:$0xff] }
  0x29   : > { %598 = vmatpush3.msra.mxu1 %v258_v14  ;;  %544 = vmatpush3.msra.mxu0 %v225_v16  ;;  %v251_v35 = vld [vmem:[#allocation2 + $0x120] sm:$0xff]  ;;  %v234_v36 = vld [vmem:[#allocation2 + $0x98] sm:$0xff]  ;;  %v233_v39 = vld [vmem:[#allocation2 + $0x90] sm:$0xff] }
  0x2a   : > { %599 = vmatprep.subr.mxu1 %v257_v17  ;;  %545 = vmatprep.subr.mxu0 %v240_v18  ;;  %v218_v37 = vld [vmem:[#allocation2 + $0x18] sm:$0xff]  ;;  %v217_v40 = vld [vmem:[#allocation2 + $0x10] sm:$0xff]  ;;  %v232_v42 = vld [vmem:[#allocation2 + $0x88] sm:$0xff] }
  0x2b   : > { %600 = vmatpush3.msra.mxu1 %v257_v17  ;;  %546 = vmatpush3.msra.mxu0 %v224_v19  ;;  %v250_v38 = vld [vmem:[#allocation2 + $0x118] sm:$0xff]  ;;  %v249_v41 = vld [vmem:[#allocation2 + $0x110] sm:$0xff]  ;;  %v211_v43 = vld [vmem:[%s792_s29 + $0x1] sm:$0xff] }
  0x2c   : > { %601 = vmatprep.subr.mxu1 %v256_v20  ;;  %547 = vmatprep.subr.mxu0 %v239_v21  ;;  %v216_v44 = vld [vmem:[#allocation2 + $0x8] sm:$0xff]  ;;  %v231_v45 = vld [vmem:[#allocation2 + $0x80] sm:$0xff] }
  0x2d   : > { %602 = vmatpush3.msra.mxu1 %v256_v20  ;;  %548 = vmatpush3.msra.mxu0 %v223_v22  ;;  %v248_v46 = vld [vmem:[#allocation2 + $0x108] sm:$0xff]  ;;  %v215_v47 = vld [vmem:[#allocation2] sm:$0xff] }
  0x2e   : > { %603 = vmatprep.subr.mxu1 %v255_v23  ;;  %549 = vmatprep.subr.mxu0 %v238_v24  ;;  %v209_v48 = vld [vmem:[%s792_s29] sm:$0xff]  ;;  %v212_v50 = vld [vmem:[%s792_s29 + $0x9] sm:$0x3f] }
  0x2f   : > { %604 = vmatpush3.msra.mxu1 %v255_v23  ;;  %550 = vmatpush3.msra.mxu0 %v222_v25  ;;  %v247_v49 = vld [vmem:[#allocation2 + $0x100] sm:$0xff]  ;;  %v214_v52 = vld [vmem:[%s792_s29 + $0xa] sm:$0x3f] }
  0x30   : > { %605 = vmatprep.subr.mxu1 %v254_v26  ;;  %551 = vmatprep.subr.mxu0 %v237_v27  ;;  %v213_v51 = vld [vmem:[%s792_s29 + $0x2] sm:$0xff]  ;;  %v528_v56 = vld [vmem:[%s819_s2] ss:$0 sm:$0xff] }
  0x31   : > { %606 = vmatpush3.msra.mxu1 %v254_v26  ;;  %552 = vmatpush3.msra.mxu0 %v221_v28  ;;  %v210_v53 = vld [vmem:[%s792_s29 + $0x8] sm:$0x3f] }
  0x32   : > { %607 = vmatprep.subr.mxu1 %v253_v29  ;;  %553 = vmatprep.subr.mxu0 %v236_v30 }
  0x33   : > { %608 = vmatpush3.msra.mxu1 %v253_v29  ;;  %554 = vmatpush3.msra.mxu0 %v220_v31 }
  0x34   : > { %609 = vmatprep.subr.mxu1 %v252_v32  ;;  %555 = vmatprep.subr.mxu0 %v235_v33 }
  0x35   : > { %610 = vmatpush3.msra.mxu1 %v252_v32  ;;  %556 = vmatpush3.msra.mxu0 %v219_v34 }
  0x36   : > { %611 = vmatprep.subr.mxu1 %v251_v35  ;;  %557 = vmatprep.subr.mxu0 %v234_v36 }
  0x37   : > { %612 = vmatpush3.msra.mxu1 %v251_v35  ;;  %558 = vmatpush3.msra.mxu0 %v218_v37 }
  0x38   : > { %613 = vmatprep.subr.mxu1 %v250_v38  ;;  %559 = vmatprep.subr.mxu0 %v233_v39 }
  0x39   : > { %614 = vmatpush3.msra.mxu1 %v250_v38  ;;  %560 = vmatpush3.msra.mxu0 %v217_v40 }
  0x3a   : > { %615 = vmatprep.subr.mxu1 %v249_v41  ;;  %561 = vmatprep.subr.mxu0 %v232_v42 }
  0x3b   : > { %334 = vmatprep.mubr.f32.mxu0 %v211_v43  ;;  %562 = vmatpush3.msra.mxu0 %v216_v44 }
  0x3c   : > { %616 = vmatpush3.msra.mxu1 %v249_v41  ;;  %563 = vmatprep.subr.mxu0 %v231_v45 }
  0x3d   : > { %617 = vmatprep.subr.mxu1 %v248_v46  ;;  %564 = vmatpush3.msra.mxu0 %v215_v47 }
  0x3e   : > { %618 = vmatpush3.msra.mxu1 %v248_v46  ;;  %335 = vmatmul.mubr.f32.vlgmr.msra.gmra.mxu0 %v209_v48 }
  0x3f   : > { %619 = vmatprep.subr.mxu1 %v247_v49  ;;  %339 = vmatprep.mubr.f32.mxu0 %v212_v50 }
  0x40   : > { %620 = vmatpush3.msra.mxu1 %v247_v49  ;;  %621 = vmatprep.mubr.f32.mxu1 %v213_v51 }
  0x41   : > { %622 = vmatmul.mubr.f32.vlgmr.msra.gmra.mxu1 %v214_v52 }
  0x42   : > { %340 = vmatmul.mubr.f32.gmra.mxu0 %v210_v53 }
  0xfe   : > { %v565_v54 = vpop.f32.mrf.mxu0 }
 0x100   : > { %v566_v55 = vpop.f32.mrf.mxu0 }
 0x101   : > { %v567_v57 = vadd.f32 %v566_v55, %v565_v54  ;;  %v623_v58 = vpop.f32.mrf.mxu1 }
 0x102   : > { %v568_v59 = vpop.f32.mrf.mxu0 }
 0x103   : > { %v337_v60 = vadd.f32 %v567_v57, %v528_v56  ;;  %v411_v61 = vpop.f32.mrf.mxu1 }
 0x104   : > { %v569_v62 = vpop.f32.mrf.mxu0 }
 0x105   : > { %v570_v63 = vadd.f32 %v569_v62, %v568_v59  ;;  %v412_v0 = vadd.f32 %v411_v61, %v337_v60 }
 0x107   : > { %v342_v1 = vadd.f32 %v570_v63, %v528_v56  ;;  %v420_v2 = vmax.f32 %v412_v0, 0.0 }
 0x109   : > { %v417_v3 = vadd.f32 %v623_v58, %v342_v1  ;;  %422 = vst [vmem:[%s207_s7] sm:$0xff] %v420_v2 }
 0x10b   : > { %v421_v4 = vmax.f32 %v417_v3, 0.0 }
 0x10d   : > { %423 = vst [vmem:[%s207_s7 + $0x8] sm:$0x3f] %v421_v4 }
 0x10e PF: > { %s14_s14 = sadd.s32 1, %s713_s14   ;;  %s823_s12 = smov %s709_s13 }
 0x10f   : > { %p11_p2 = scmp.ge.s32.totalorder %s14_s14, 4   ;;  %s824_s13 = smov %s826_s16 }
 0x111   :  { %13 = sbr.rel (!%p11_p2) target bundleno = 2 (0x2), region = 67 }
 0x116   :  { %454 = vsyncpa [#allocation3], 1 }
 0x117   :  { %456 = vsyncpa [#allocation3 + $0x1], 1 }

// kernel: _forward_impl.3
= control target key start
LH: loop header
LB: loop body
LE: loop exit
PB: predicated region body
PF: predicated region fallthrough
CT: control target
= control target key end

     0   :  { %8 = vsyncpa [#allocation3], 0  ;;  %s887_s12 = smov 0   ;;  %s889_s13 = smov 0   ;;  %s970_s0 = inlined_call_operand.vmem [shape: f32[2,14,128], index: 0, kind: input, shape index: {}]   ;;  %s971_s1 = inlined_call_operand.hbm [shape: f32[640,128], index: 1, kind: input, shape index: {}]   ;;  %s972_s2 = inlined_call_operand.vmem [shape: f32[1,128], index: 2, kind: input, shape index: {}]   ;;  %s973_s3 = inlined_call_operand.vmem [shape: f32[2,10,128], index: 3, kind: output, shape index: {}]  }
   0x1   :  { %s891_s14 = smov 0  }
   0x2 LB: > { %s628_s15 = sadd.s32 4294967295, %s862_s14   ;;  %s26_s16 = sadd.s32 1, %s858_s13  ;;  %s862_s14 = sphi %s891_s14, %s14_s14   ;;  %s858_s13 = sphi %s889_s13, %s977_s13   ;;  %s854_s12 = sphi %s887_s12, %s976_s12  }
   0x3   : > { %p28_p0 = scmp.ge.s32.totalorder %s26_s16, 2  ;;  %p630_p1 = scmp.ge.s32.totalorder %s862_s14, 1 }
   0x4   : > { %p127_p2 = scmp.lt.s32.totalorder %s862_s14, 3  ;;  %p912_p4 = scmp.eq.s32.totalorder %s628_s15, 0 }
   0x5   : > { %s979_s16 = smov (%p28_p0, %s26_s16), 0  ;;  %s864_s19 = smov [#allocation2]  }
   0x6   : > { %p908_p3 = pnand %p630_p1, %p127_p2  ;;  %s139_s20 = sshll.u32 %s864_s19, 4  ;;  %s140_s20 = int_to_ptr.vmem [resolvable:$true] %s139_s20 }
   0x7   : > { %s821_s21 = scalar_lea.vmem %s140_s20, 10240  ;;  %p829_p11 = scmp.lt.s32.totalorder %s140_s20, %s140_s20 }
   0x8   : > { %p777_p5 = pneg %p908_p3  ;;  %p822_p8 = scmp.ne.s32.totalorder %s140_s20, %s821_s21 }
   0x9   : > { %p830_p12 = scmp.lt.s32.totalorder %s821_s21, %s821_s21 }
   0xa   : > { %p778_p6 = pnand %p912_p4, %p777_p5 }
   0xb   : > { %p831_p13 = por %p830_p12, %p829_p11 }
   0xc   : > { %p812_p7 = pneg %p778_p6 }
   0xe   : > { %p824_p9 = pnand %p822_p8, %p812_p7 }
  0x10   : > { %p825_p10 = pneg %p824_p9 }
  0x12   : > { %p832_p0 = pnand %p831_p13, %p825_p10 }
  0x14   : > { %835 = shalt.err (!%p832_p0)
}
  0x15   : > { %s865_s22 = smov 128   ;;  %s866_s23 = smov 8  }
  0x16   : > { %780 = dma.hbm_to_vmem [thread:$0]  (!%p778_p6), %s971_s1, 10240, %s140_s20, [#allocation3], %s865_s22, %s865_s22, %s866_s23  }
  0x17   : > { %166 = sbr.rel (%p908_p3) target bundleno = 296 (0x128), region = 32 }
  0x1c   : > { %849 = dma.done.wait (%p912_p4), [#allocation3], 10240  }
  0x1d   : > { %851 = vsyncadd (%p912_p4), [#allocation3], 4294957056  ;;  %v250_v0 = vld [vmem:[#allocation2 + $0xf8] sm:$0xff]  ;;  %v249_v2 = vld [vmem:[#allocation2 + $0xf0] sm:$0xff]  ;;  %p194_p1 = scmp.lt.s32.totalorder %s854_s12, 1 }
  0x1e   : > { %v234_v1 = vld [vmem:[#allocation2 + $0x78] sm:$0xff]  ;;  %644 = vmatprep.subr.mxu0 %v250_v0  ;;  %v233_v4 = vld [vmem:[#allocation2 + $0x70] sm:$0xff]  ;;  %v248_v6 = vld [vmem:[#allocation2 + $0xe8] sm:$0xff] }
  0x1f   : > { %v282_v3 = vld [vmem:[#allocation2 + $0x1f8] sm:$0xff]  ;;  %645 = vmatpush3.msra.mxu0 %v234_v1  ;;  %v281_v7 = vld [vmem:[#allocation2 + $0x1f0] sm:$0xff]  ;;  %v232_v8 = vld [vmem:[#allocation2 + $0x68] sm:$0xff]  ;;  %s981_s12 = smov (!%p194_p1, %s854_s12), 1 }
  0x20   : > { %v266_v5 = vld [vmem:[#allocation2 + $0x178] sm:$0xff]  ;;  %682 = vmatprep.subr.mxu1 %v282_v3  ;;  %646 = vmatprep.subr.mxu0 %v249_v2  ;;  %v265_v9 = vld [vmem:[#allocation2 + $0x170] sm:$0xff]  ;;  %v280_v10 = vld [vmem:[#allocation2 + $0x1e8] sm:$0xff]  ;;  %s642_s26 = sshll.u32 %s981_s12, 4 }
  0x21   : > { %683 = vmatpush3.msra.mxu1 %v266_v5  ;;  %647 = vmatpush3.msra.mxu0 %v233_v4  ;;  %v247_v11 = vld [vmem:[#allocation2 + $0xe0] sm:$0xff]  ;;  %v264_v12 = vld [vmem:[#allocation2 + $0x168] sm:$0xff]  ;;  %v246_v15 = vld [vmem:[#allocation2 + $0xd8] sm:$0xff]  ;;  %s941_s29 = scalar_lea.vmem %s970_s0, %s642_s26  ;;  %s207_s7 = scalar_lea.vmem %s973_s3, %s642_s26 }
  0x22   : > { %684 = vmatprep.subr.mxu1 %v281_v7  ;;  %648 = vmatprep.subr.mxu0 %v248_v6  ;;  %v231_v13 = vld [vmem:[#allocation2 + $0x60] sm:$0xff]  ;;  %v230_v17 = vld [vmem:[#allocation2 + $0x58] sm:$0xff]  ;;  %v245_v19 = vld [vmem:[#allocation2 + $0xd0] sm:$0xff] }
  0x23   : > { %685 = vmatpush3.msra.mxu1 %v265_v9  ;;  %v279_v14 = vld [vmem:[#allocation2 + $0x1e0] sm:$0xff]  ;;  %649 = vmatpush3.msra.mxu0 %v232_v8  ;;  %v278_v18 = vld [vmem:[#allocation2 + $0x1d8] sm:$0xff]  ;;  %v229_v21 = vld [vmem:[#allocation2 + $0x50] sm:$0xff] }
  0x24   : > { %686 = vmatprep.subr.mxu1 %v280_v10  ;;  %v263_v16 = vld [vmem:[#allocation2 + $0x160] sm:$0xff]  ;;  %650 = vmatprep.subr.mxu0 %v247_v11  ;;  %v262_v20 = vld [vmem:[#allocation2 + $0x158] sm:$0xff]  ;;  %v277_v22 = vld [vmem:[#allocation2 + $0x1d0] sm:$0xff] }
  0x25   : > { %687 = vmatpush3.msra.mxu1 %v264_v12  ;;  %651 = vmatpush3.msra.mxu0 %v231_v13  ;;  %v244_v23 = vld [vmem:[#allocation2 + $0xc8] sm:$0xff]  ;;  %v261_v24 = vld [vmem:[#allocation2 + $0x150] sm:$0xff]  ;;  %v243_v27 = vld [vmem:[#allocation2 + $0xc0] sm:$0xff] }
  0x26   : > { %688 = vmatprep.subr.mxu1 %v279_v14  ;;  %652 = vmatprep.subr.mxu0 %v246_v15  ;;  %v228_v25 = vld [vmem:[#allocation2 + $0x48] sm:$0xff]  ;;  %v227_v29 = vld [vmem:[#allocation2 + $0x40] sm:$0xff]  ;;  %v242_v31 = vld [vmem:[#allocation2 + $0xb8] sm:$0xff] }
  0x27   : > { %689 = vmatpush3.msra.mxu1 %v263_v16  ;;  %653 = vmatpush3.msra.mxu0 %v230_v17  ;;  %v276_v26 = vld [vmem:[#allocation2 + $0x1c8] sm:$0xff]  ;;  %v275_v30 = vld [vmem:[#allocation2 + $0x1c0] sm:$0xff]  ;;  %v226_v33 = vld [vmem:[#allocation2 + $0x38] sm:$0xff] }
  0x28   : > { %690 = vmatprep.subr.mxu1 %v278_v18  ;;  %654 = vmatprep.subr.mxu0 %v245_v19  ;;  %v260_v28 = vld [vmem:[#allocation2 + $0x148] sm:$0xff]  ;;  %v259_v32 = vld [vmem:[#allocation2 + $0x140] sm:$0xff]  ;;  %v274_v34 = vld [vmem:[#allocation2 + $0x1b8] sm:$0xff] }
  0x29   : > { %691 = vmatpush3.msra.mxu1 %v262_v20  ;;  %655 = vmatpush3.msra.mxu0 %v229_v21  ;;  %v241_v35 = vld [vmem:[#allocation2 + $0xb0] sm:$0xff]  ;;  %v258_v36 = vld [vmem:[#allocation2 + $0x138] sm:$0xff]  ;;  %v240_v39 = vld [vmem:[#allocation2 + $0xa8] sm:$0xff] }
  0x2a   : > { %692 = vmatprep.subr.mxu1 %v277_v22  ;;  %656 = vmatprep.subr.mxu0 %v244_v23  ;;  %v225_v37 = vld [vmem:[#allocation2 + $0x30] sm:$0xff]  ;;  %v224_v41 = vld [vmem:[#allocation2 + $0x28] sm:$0xff]  ;;  %v239_v43 = vld [vmem:[#allocation2 + $0xa0] sm:$0xff] }
  0x2b   : > { %693 = vmatpush3.msra.mxu1 %v261_v24  ;;  %657 = vmatpush3.msra.mxu0 %v228_v25  ;;  %v273_v38 = vld [vmem:[#allocation2 + $0x1b0] sm:$0xff]  ;;  %v272_v42 = vld [vmem:[#allocation2 + $0x1a8] sm:$0xff]  ;;  %v223_v45 = vld [vmem:[#allocation2 + $0x20] sm:$0xff] }
  0x2c   : > { %694 = vmatprep.subr.mxu1 %v276_v26  ;;  %658 = vmatprep.subr.mxu0 %v243_v27  ;;  %v257_v40 = vld [vmem:[#allocation2 + $0x130] sm:$0xff]  ;;  %v256_v44 = vld [vmem:[#allocation2 + $0x128] sm:$0xff]  ;;  %v271_v46 = vld [vmem:[#allocation2 + $0x1a0] sm:$0xff] }
  0x2d   : > { %695 = vmatpush3.msra.mxu1 %v260_v28  ;;  %659 = vmatpush3.msra.mxu0 %v227_v29  ;;  %v238_v47 = vld [vmem:[#allocation2 + $0x98] sm:$0xff]  ;;  %v255_v48 = vld [vmem:[#allocation2 + $0x120] sm:$0xff]  ;;  %v237_v51 = vld [vmem:[#allocation2 + $0x90] sm:$0xff] }
  0x2e   : > { %696 = vmatprep.subr.mxu1 %v275_v30  ;;  %660 = vmatprep.subr.mxu0 %v242_v31  ;;  %v222_v49 = vld [vmem:[#allocation2 + $0x18] sm:$0xff]  ;;  %v221_v53 = vld [vmem:[#allocation2 + $0x10] sm:$0xff]  ;;  %v236_v55 = vld [vmem:[#allocation2 + $0x88] sm:$0xff] }
  0x2f   : > { %697 = vmatpush3.msra.mxu1 %v259_v32  ;;  %661 = vmatpush3.msra.mxu0 %v226_v33  ;;  %v270_v50 = vld [vmem:[#allocation2 + $0x198] sm:$0xff]  ;;  %v269_v54 = vld [vmem:[#allocation2 + $0x190] sm:$0xff]  ;;  %v220_v57 = vld [vmem:[#allocation2 + $0x8] sm:$0xff] }
  0x30   : > { %698 = vmatprep.subr.mxu1 %v274_v34  ;;  %662 = vmatprep.subr.mxu0 %v241_v35  ;;  %v254_v52 = vld [vmem:[#allocation2 + $0x118] sm:$0xff]  ;;  %v253_v56 = vld [vmem:[#allocation2 + $0x110] sm:$0xff]  ;;  %v268_v58 = vld [vmem:[#allocation2 + $0x188] sm:$0xff] }
  0x31   : > { %699 = vmatpush3.msra.mxu1 %v258_v36  ;;  %663 = vmatpush3.msra.mxu0 %v225_v37  ;;  %v235_v59 = vld [vmem:[#allocation2 + $0x80] sm:$0xff]  ;;  %v252_v62 = vld [vmem:[#allocation2 + $0x108] sm:$0xff]  ;;  %v298_v1 = vld [vmem:[#allocation2 + $0x278] sm:$0xff] }
  0x32   : > { %700 = vmatprep.subr.mxu1 %v273_v38  ;;  %664 = vmatprep.subr.mxu0 %v240_v39  ;;  %v211_v60 = vld [vmem:[%s941_s29 + $0x1] sm:$0xff]  ;;  %v297_v5 = vld [vmem:[#allocation2 + $0x270] sm:$0xff]  ;;  %v212_v6 = vld [vmem:[%s941_s29 + $0x9] sm:$0x3] }
  0x33   : > { %701 = vmatpush3.msra.mxu1 %v257_v40  ;;  %665 = vmatpush3.msra.mxu0 %v224_v41  ;;  %v219_v61 = vld [vmem:[#allocation2] sm:$0xff]  ;;  %v296_v7 = vld [vmem:[#allocation2 + $0x268] sm:$0xff]  ;;  %v294_v13 = vld [vmem:[#allocation2 + $0x258] sm:$0xff] }
  0x34   : > { %702 = vmatprep.subr.mxu1 %v272_v42  ;;  %666 = vmatprep.subr.mxu0 %v239_v43  ;;  %v209_v63 = vld [vmem:[%s941_s29] sm:$0xff]  ;;  %v210_v8 = vld [vmem:[%s941_s29 + $0x8] sm:$0x3]  ;;  %v216_v9 = vld [vmem:[%s941_s29 + $0xb] sm:$0x3] }
  0x35   : > { %703 = vmatpush3.msra.mxu1 %v256_v44  ;;  %667 = vmatpush3.msra.mxu0 %v223_v45  ;;  %v267_v0 = vld [vmem:[#allocation2 + $0x180] sm:$0xff]  ;;  %v214_v11 = vld [vmem:[%s941_s29 + $0xa] sm:$0x3]  ;;  %v293_v14 = vld [vmem:[#allocation2 + $0x250] sm:$0xff] }
  0x36   : > { %704 = vmatprep.subr.mxu1 %v271_v46  ;;  %668 = vmatprep.subr.mxu0 %v238_v47  ;;  %v251_v2 = vld [vmem:[#allocation2 + $0x100] sm:$0xff]  ;;  %v292_v15 = vld [vmem:[#allocation2 + $0x248] sm:$0xff]  ;;  %v290_v17 = vld [vmem:[#allocation2 + $0x238] sm:$0xff] }
  0x37   : > { %705 = vmatpush3.msra.mxu1 %v255_v48  ;;  %669 = vmatpush3.msra.mxu0 %v222_v49  ;;  %v215_v3 = vld [vmem:[%s941_s29 + $0x3] sm:$0xff]  ;;  %v289_v18 = vld [vmem:[#allocation2 + $0x230] sm:$0xff]  ;;  %v286_v21 = vld [vmem:[#allocation2 + $0x218] sm:$0xff] }
  0x38   : > { %706 = vmatprep.subr.mxu1 %v270_v50  ;;  %670 = vmatprep.subr.mxu0 %v237_v51  ;;  %v213_v4 = vld [vmem:[%s941_s29 + $0x2] sm:$0xff]  ;;  %v285_v22 = vld [vmem:[#allocation2 + $0x210] sm:$0xff]  ;;  %v218_v25 = vld [vmem:[%s941_s29 + $0xc] sm:$0x3] }
  0x39   : > { %707 = vmatpush3.msra.mxu1 %v254_v52  ;;  %671 = vmatpush3.msra.mxu0 %v221_v53  ;;  %v295_v10 = vld [vmem:[#allocation2 + $0x260] sm:$0xff]  ;;  %v288_v19 = vld [vmem:[#allocation2 + $0x228] sm:$0xff] }
  0x3a   : > { %708 = vmatprep.subr.mxu1 %v269_v54  ;;  %672 = vmatprep.subr.mxu0 %v236_v55  ;;  %v217_v12 = vld [vmem:[%s941_s29 + $0x4] sm:$0xff]  ;;  %v639_v35 = vld [vmem:[%s972_s2] ss:$0 sm:$0xff] }
  0x3b   : > { %709 = vmatpush3.msra.mxu1 %v253_v56  ;;  %673 = vmatpush3.msra.mxu0 %v220_v57  ;;  %v291_v16 = vld [vmem:[#allocation2 + $0x240] sm:$0xff]  ;;  %v284_v23 = vld [vmem:[#allocation2 + $0x208] sm:$0xff] }
  0x3c   : > { %710 = vmatprep.subr.mxu1 %v268_v58  ;;  %674 = vmatprep.subr.mxu0 %v235_v59  ;;  %v287_v20 = vld [vmem:[#allocation2 + $0x220] sm:$0xff] }
  0x3d   : > { %370 = vmatprep.mubr.f32.mxu0 %v211_v60  ;;  %675 = vmatpush3.msra.mxu0 %v219_v61  ;;  %v283_v24 = vld [vmem:[#allocation2 + $0x200] sm:$0xff] }
  0x3e   : > { %711 = vmatpush3.msra.mxu1 %v252_v62  ;;  %371 = vmatmul.mubr.f32.vlgmr.msra.gmra.mxu0 %v209_v63 }
  0x3f   : > { %712 = vmatprep.subr.mxu1 %v267_v0  ;;  %738 = vmatprep.subr.mxu0 %v298_v1 }
  0x40   : > { %713 = vmatpush3.msra.mxu1 %v251_v2  ;;  %445 = vmatprep.mubr.f32.mxu1 %v215_v3 }
  0x41   : > { %739 = vmatpush3.msra.mxu0 %v298_v1  ;;  %446 = vmatmul.mubr.f32.vlgmr.msra.gmra.mxu1 %v213_v4 }
  0x42   : > { %740 = vmatprep.subr.mxu0 %v297_v5  ;;  %375 = vmatprep.mubr.f32.mxu0 %v212_v6 }
  0x43   : > { %741 = vmatpush3.msra.mxu0 %v297_v5  ;;  %450 = vmatprep.mubr.f32.mxu1 %v216_v9 }
  0x44   : > { %742 = vmatprep.subr.mxu0 %v296_v7  ;;  %376 = vmatmul.mubr.f32.gmra.mxu0 %v210_v8 }
  0x45   : > { %743 = vmatpush3.msra.mxu0 %v296_v7  ;;  %451 = vmatmul.mubr.f32.gmra.mxu1 %v214_v11 }
  0x46   : > { %744 = vmatprep.subr.mxu0 %v295_v10  ;;  %770 = vmatprep.mubr.f32.mxu0 %v217_v12 }
  0x47   : > { %745 = vmatpush3.msra.mxu0 %v295_v10 }
  0x48   : > { %746 = vmatprep.subr.mxu0 %v294_v13 }
  0x49   : > { %747 = vmatpush3.msra.mxu0 %v294_v13 }
  0x4a   : > { %748 = vmatprep.subr.mxu0 %v293_v14 }
  0x4b   : > { %749 = vmatpush3.msra.mxu0 %v293_v14 }
  0x4c   : > { %750 = vmatprep.subr.mxu0 %v292_v15 }
  0x4d   : > { %751 = vmatpush3.msra.mxu0 %v292_v15 }
  0x4e   : > { %752 = vmatprep.subr.mxu0 %v291_v16 }
  0x4f   : > { %753 = vmatpush3.msra.mxu0 %v291_v16 }
  0x50   : > { %754 = vmatprep.subr.mxu0 %v290_v17 }
  0x51   : > { %755 = vmatpush3.msra.mxu0 %v290_v17 }
  0x52   : > { %756 = vmatprep.subr.mxu0 %v289_v18 }
  0x53   : > { %757 = vmatpush3.msra.mxu0 %v289_v18 }
  0x54   : > { %758 = vmatprep.subr.mxu0 %v288_v19 }
  0x55   : > { %759 = vmatpush3.msra.mxu0 %v288_v19 }
  0x56   : > { %760 = vmatprep.subr.mxu0 %v287_v20 }
  0x57   : > { %761 = vmatpush3.msra.mxu0 %v287_v20 }
  0x58   : > { %762 = vmatprep.subr.mxu0 %v286_v21 }
  0x59   : > { %763 = vmatpush3.msra.mxu0 %v286_v21 }
  0x5a   : > { %764 = vmatprep.subr.mxu0 %v285_v22 }
  0x5b   : > { %765 = vmatpush3.msra.mxu0 %v285_v22 }
  0x5c   : > { %766 = vmatprep.subr.mxu0 %v284_v23 }
  0x5d   : > { %767 = vmatpush3.msra.mxu0 %v284_v23 }
  0x5e   : > { %768 = vmatprep.subr.mxu0 %v283_v24 }
  0x5f   : > { %769 = vmatpush3.msra.mxu0 %v283_v24 }
  0x60   : > { %771 = vmatmul.mubr.f32.vlgmr.msra.gmra.mxu0 %v218_v25 }
  0xfe   : > { %v676_v26 = vpop.f32.mrf.mxu0 }
 0x100   : > { %v677_v27 = vpop.f32.mrf.mxu0 }
 0x101   : > { %v714_v28 = vpop.f32.mrf.mxu1  ;;  %v678_v36 = vadd.f32 %v677_v27, %v676_v26 }
 0x103   : > { %v715_v30 = vpop.f32.mrf.mxu1  ;;  %v373_v39 = vadd.f32 %v678_v36, %v639_v35 }
 0x104   : > { %v679_v29 = vpop.f32.mrf.mxu0  ;;  %v716_v40 = vadd.f32 %v715_v30, %v714_v28 }
 0x105   : > { %v717_v32 = vpop.f32.mrf.mxu1 }
 0x106   : > { %v680_v31 = vpop.f32.mrf.mxu0  ;;  %v448_v44 = vadd.f32 %v716_v40, %v373_v39 }
 0x107   : > { %v681_v33 = vadd.f32 %v680_v31, %v679_v29  ;;  %v718_v34 = vpop.f32.mrf.mxu1 }
 0x108   : > { %v719_v38 = vadd.f32 %v718_v34, %v717_v32 }
 0x109   : > { %v378_v37 = vadd.f32 %v681_v33, %v639_v35 }
 0x10b   : > { %v453_v41 = vadd.f32 %v719_v38, %v378_v37 }
 0x120   : > { %v772_v42 = vpop.f32.mrf.mxu0 }
 0x121   : > { %v528_v43 = vadd.f32 %v772_v42, %v453_v41 }
 0x122   : > { %v522_v45 = vpop.f32.mrf.mxu0 }
 0x123   : > { %v532_v46 = vmax.f32 %v528_v43, 0.0  ;;  %v523_v47 = vadd.f32 %v522_v45, %v448_v44 }
 0x125   : > { %534 = vst [vmem:[%s207_s7 + $0x8] sm:$0x3] %v532_v46  ;;  %v531_v48 = vmax.f32 %v523_v47, 0.0 }
 0x127   : > { %533 = vst [vmem:[%s207_s7] sm:$0xff] %v531_v48 }
 0x128 PF: > { %s14_s14 = sadd.s32 1, %s862_s14   ;;  %s976_s12 = smov %s858_s13 }
 0x129   : > { %p11_p2 = scmp.ge.s32.totalorder %s14_s14, 4   ;;  %s977_s13 = smov %s979_s16 }
 0x12b   :  { %13 = sbr.rel (!%p11_p2) target bundleno = 2 (0x2), region = 67 }
 0x130   :  { %565 = vsyncpa [#allocation3], 1 }
 0x131   :  { %567 = vsyncpa [#allocation3 + $0x1], 1 }

</bundles_post_ra>
